<compile_context>
chip_gen: v6e
topology: v6e:2x2x1
jax: 0.10.0
libtpu: 0.0.40
codegen_flags: <defaults>
</compile_context>

<pallas_src>
import functools

import jax
import jax.numpy as jnp
import numpy as np
from jax import lax
from jax.experimental import pallas as pl
from jax.experimental.pallas import tpu as pltpu

TOP_K = 5
_LANE = 128


def _round_up(n, m):
    return (n + m - 1) // m * m


# ---------------------------------------------------------------------------
# DFT bases: built once in NumPy (float64), cached, cast to the basis dtype.
# F is padded to Fp with zero rows: zero bins never change the top-k threshold
# (k <= F) and contribute nothing to the inverse sum.
# ---------------------------------------------------------------------------
@functools.lru_cache(maxsize=None)
def _dft_bases(L, Fp, dtype_name):
    F = L // 2 + 1
    t = np.arange(L, dtype=np.float64)
    f = np.arange(F, dtype=np.float64)
    ang = 2.0 * np.pi * np.outer(f, t) / L                        # [F, L]

    # forward: [Xr ; Xi] = fwd @ x^T   (Xr = sum x cos, Xi = -sum x sin)
    fwd = np.zeros((2 * Fp, L), dtype=np.float64)
    fwd[:F] = np.cos(ang)
    fwd[Fp:Fp + F] = -np.sin(ang)

    # inverse (irfft): x[t] = sum_f w[f] * (Xr[f] cos - Xi[f] sin)
    w = np.full((F,), 2.0 / L)
    w[0] = 1.0 / L
    if L % 2 == 0:
        w[F - 1] = 1.0 / L                                        # Nyquist bin
    icos = np.zeros((Fp, L), dtype=np.float64)
    isin = np.zeros((Fp, L), dtype=np.float64)
    icos[:F] = np.cos(ang) * w[:, None]
    isin[:F] = -np.sin(ang) * w[:, None]

    dt = jnp.dtype(dtype_name)
    return (jnp.asarray(fwd, dtype=dt),
            jnp.asarray(icos, dtype=dt),
            jnp.asarray(isin, dtype=dt))


# ---------------------------------------------------------------------------
# Shared forward DFT + squared magnitude (used identically by both passes so
# mag2 is bitwise-identical -> the threshold semantics are exact).
# ---------------------------------------------------------------------------
def _forward_mag2(xt, fwd, grid_col0):
    # One fused MXU dot, contracting the time axis (rhs-transposed matmul).
    xf = lax.dot_general(fwd, xt.astype(fwd.dtype),
                         (((1,), (1,)), ((), ())),
                         preferred_element_type=jnp.float32)      # [2Fp, tB]
    Fp = fwd.shape[0] // 2
    tB = xt.shape[0]
    Xr = xf[:Fp, :]
    Xi = xf[Fp:, :]
    mag2 = Xr * Xr + Xi * Xi                                      # [Fp, tB]
    # Module quirk: freq[0] = 0 zeroes the first *batch* row, i.e. global batch
    # column 0 in this layout (only present in grid block 0).
    gcol = jax.lax.broadcasted_iota(jnp.int32, (Fp, tB), 1) + grid_col0
    mag2 = jnp.where(gcol == 0, 0.0, mag2)
    return Xr, Xi, mag2


# ---------------------------------------------------------------------------
# Pass 1: forward DFT + per-batch-column k-th largest squared magnitude.
# ---------------------------------------------------------------------------
def _pass1_kernel(top_k, x_ref, fwd_ref, kth2_ref):
    xt = x_ref[...]                                               # [tB, L] f32
    tB = xt.shape[0]
    _, _, mag2 = _forward_mag2(xt, fwd_ref[...], pl.program_id(0) * tB)
    Fp = mag2.shape[0]

    # Exact k-th largest with multiplicity (matching torch.topk().min()):
    # k-step knock-out of the first occurrence of the running maximum.
    row = jax.lax.broadcasted_iota(jnp.int32, (Fp, tB), 0)
    work = mag2
    kth2 = None
    for _ in range(top_k):
        kth2 = jnp.max(work, axis=0, keepdims=True)               # [1, tB]
        first = jnp.min(jnp.where(work == kth2, row, Fp),
                        axis=0, keepdims=True)
        work = jnp.where(row == first, -jnp.inf, work)
    kth2_ref[...] = kth2


# ---------------------------------------------------------------------------
# Pass 2: recompute spectrum, mask at the global threshold, inverse DFT, trend.
# ---------------------------------------------------------------------------
def _pass2_kernel(thr2_ref, x_ref, fwd_ref, icos_ref, isin_ref,
                  season_ref, trend_ref):
    xt = x_ref[...]                                               # [tB, L] f32
    tB = xt.shape[0]
    Xr, Xi, mag2 = _forward_mag2(xt, fwd_ref[...], pl.program_id(0) * tB)

    thr2 = thr2_ref[0]                                            # SMEM scalar
    keep = mag2 > thr2                                            # [Fp, tB]
    icos = icos_ref[...]                                          # [Fp, L]
    isin = isin_ref[...]
    Xr_k = jnp.where(keep, Xr, 0.0).astype(icos.dtype)
    Xi_k = jnp.where(keep, Xi, 0.0).astype(icos.dtype)

    # season[b, t] = sum_f Xr_k[f, b] icos[f, t] + Xi_k[f, b] isin[f, t]
    season = lax.dot_general(Xr_k, icos, (((0,), (0,)), ((), ())),
                             preferred_element_type=jnp.float32)  # [tB, L]
    season += lax.dot_general(Xi_k, isin, (((0,), (0,)), ((), ())),
                              preferred_element_type=jnp.float32)
    season_ref[...] = season
    trend_ref[...] = xt - season


# ---------------------------------------------------------------------------
# Wrapper helpers
# ---------------------------------------------------------------------------
def _batch_tiling(B):
    """Lane-dense tiles; pad the batch UP to the tile instead of shrinking the
    tile; keep the grid >= 2 when possible (megacore split on v7x)."""
    Bp128 = _round_up(B, _LANE)
    if Bp128 <= _LANE:
        return _LANE, _LANE
    if Bp128 < 2 * 512:
        tB = _round_up(Bp128 // 2, _LANE)      # two roughly equal tiles
    else:
        tB = 512
    return tB, _round_up(B, tB)


def _vmem_limit_bytes(L, Fp, tB, basis_itemsize, basis_single_buffered):
    f32 = 4
    io_tiles = 3 * tB * L * f32 * 2                 # x, season, trend (double-buffered)
    kth = 2 * tB * f32 * 2
    nbuf = 1 if basis_single_buffered else 2
    bases = 4 * Fp * L * basis_itemsize * nbuf      # fwd (2Fp rows) + icos + isin
    temps = 12 * Fp * tB * f32                      # xf / Xr / Xi / mag2 / knock-out state
    est = int(1.5 * (io_tiles + kth + bases + temps)) + (4 << 20)
    try:
        cap = pltpu.get_tpu_info().vmem_capacity_bytes   # 128 MiB v5e/v6e, 64 MiB v7x
    except Exception:                                    # pragma: no cover
        cap = 128 << 20
    return int(min(max(est, 32 << 20), int(cap * 0.85)))


@functools.partial(jax.jit, static_argnames=("top_k", "basis_dtype"))
def dft_series_decomp(x, top_k=TOP_K, basis_dtype=jnp.bfloat16):
    """Pallas TPU implementation of DFT_series_decomp.forward for x: [B, L]."""
    x = jnp.asarray(x, jnp.float32)
    B, L = x.shape
    F = L // 2 + 1
    k = min(top_k, F)

    dt = jnp.dtype(basis_dtype)
    Fp = _round_up(F, 8 if dt.itemsize == 4 else 16)   # aligned MXU/vreg tiles
    # TODO(synk): for very large L the [2Fp, L] bases exceed VMEM; a
    # time/frequency-tiled variant would be needed there.
    fwd, icos, isin = _dft_bases(L, Fp, dt.name)

    tB, Bp = _batch_tiling(B)
    x_p = x if Bp == B else jnp.pad(x, ((0, Bp - B), (0, 0)))
    grid = (Bp // tB,)

    # Constant bases: single-buffer once they are big enough to matter (their
    # block never changes; double-buffering them only wastes VMEM).
    single_buf = (2 * Fp * L * dt.itemsize) > (512 << 10)

    def _basis_spec(shape):
        kwargs = {"pipeline_mode": pl.Buffered(1)} if single_buf else {}
        return pl.BlockSpec(shape, lambda i: (0, 0), **kwargs)

    cparams = pltpu.CompilerParams(
        dimension_semantics=("parallel",),
        vmem_limit_bytes=_vmem_limit_bytes(L, Fp, tB, dt.itemsize, single_buf))

    # ---- pass 1: forward DFT + per-batch k-th largest squared magnitude ----
    kth2 = pl.pallas_call(
        functools.partial(_pass1_kernel, k),
        grid=grid,
        in_specs=[
            pl.BlockSpec((tB, L), lambda i: (i, 0)),              # x tile (natural)
            _basis_spec((2 * Fp, L)),                             # fused fwd basis
        ],
        out_specs=pl.BlockSpec((1, tB), lambda i: (0, i)),        # k-th |.|^2
        out_shape=jax.ShapeDtypeStruct((1, Bp), jnp.float32),
        compiler_params=cparams,
    )(x_p, fwd)

    # Global (squared) threshold = min over the real (unpadded) batch rows.
    thr2 = jnp.min(kth2[0, :B]).reshape(1)

    # ---- pass 2: recompute spectrum, mask, inverse DFT, trend --------------
    season_p, trend_p = pl.pallas_call(
        _pass2_kernel,
        grid=grid,
        in_specs=[
            pl.BlockSpec(memory_space=pltpu.MemorySpace.SMEM),    # thr^2 (1,)
            pl.BlockSpec((tB, L), lambda i: (i, 0)),              # x tile
            _basis_spec((2 * Fp, L)),                             # fwd basis
            _basis_spec((Fp, L)),                                 # inverse cos
            _basis_spec((Fp, L)),                                 # inverse sin
        ],
        out_specs=(
            pl.BlockSpec((tB, L), lambda i: (i, 0)),
            pl.BlockSpec((tB, L), lambda i: (i, 0)),
        ),
        out_shape=(jax.ShapeDtypeStruct((Bp, L), jnp.float32),
                   jax.ShapeDtypeStruct((Bp, L), jnp.float32)),
        compiler_params=cparams,
    )(thr2, x_p, fwd, icos, isin)

    if Bp != B:
        season_p = season_p[:B]
        trend_p = trend_p[:B]
    return season_p, trend_p


# ---------------------------------------------------------------------------
# Pure-JAX reference mirroring the PyTorch forward exactly.
# ---------------------------------------------------------------------------
def _reference(x, top_k=TOP_K):
    xf = jnp.fft.rfft(x)
    freq = jnp.abs(xf)
    freq = freq.at[0].set(0.0)
    k = min(top_k, freq.shape[-1])
    top_vals, _ = jax.lax.top_k(freq, k)
    thresh = jnp.min(top_vals)
    xf = jnp.where(freq <= thresh, jnp.complex64(0), xf)
    season = jnp.fft.irfft(xf, n=x.shape[-1])
    trend = x - season
    return season, trend


if __name__ == "__main__":
    key = jax.random.PRNGKey(0)
    B, L = 8, 16
    x = jax.random.normal(key, (B, L), dtype=jnp.float32)

    # Default path (bfloat16 bases: native MXU dtype on v6e/v7x).
    season_bf, trend_bf = dft_series_decomp(x, top_k=TOP_K)
    jax.block_until_ready((season_bf, trend_bf))
    assert season_bf.shape == (B, L) and trend_bf.shape == (B, L)
    assert bool(jnp.all(jnp.isfinite(season_bf))) and bool(jnp.all(jnp.isfinite(trend_bf)))

    # float32 bases for the tight accuracy check against the reference.
    season, trend = dft_series_decomp(x, top_k=TOP_K, basis_dtype=jnp.float32)
    jax.block_until_ready((season, trend))

    ref_season, ref_trend = _reference(x, top_k=TOP_K)
    np.testing.assert_allclose(np.asarray(season), np.asarray(ref_season),
                               atol=5e-3, rtol=5e-3)
    np.testing.assert_allclose(np.asarray(trend), np.asarray(ref_trend),
                               atol=5e-3, rtol=5e-3)

    print("KERNEL_OK")
</pallas_src>

<mosaic_0001>
module attributes {stable_mosaic.version = 11 : i64} {
  func.func @_pass2_kernel(%arg0: i32, %arg1: memref<1xf32, #tpu.memory_space<smem>>, %arg2: memref<128x16xf32, #tpu.memory_space<vmem>>, %arg3: memref<32x16xbf16, #tpu.memory_space<vmem>>, %arg4: memref<16x16xbf16, #tpu.memory_space<vmem>>, %arg5: memref<16x16xbf16, #tpu.memory_space<vmem>>, %arg6: memref<128x16xf32, #tpu.memory_space<vmem>>, %arg7: memref<128x16xf32, #tpu.memory_space<vmem>>) attributes {dimension_semantics = [#tpu.dimension_semantics<parallel>], iteration_bounds = array<i64: 1>, scalar_prefetch = 0 : i64, scratch_operands = 0 : i64, tpu.core_type = #tpu.core_type<tc>, window_params = [{transform_indices = @transform_0, window_bounds = array<i64: 1>}, {transform_indices = @transform_1, window_bounds = array<i64: 128, 16>}, {pipeline_mode = #tpu.pipeline_mode<synchronous>, transform_indices = @transform_2, window_bounds = array<i64: 32, 16>}, {pipeline_mode = #tpu.pipeline_mode<synchronous>, transform_indices = @transform_3, window_bounds = array<i64: 16, 16>}, {pipeline_mode = #tpu.pipeline_mode<synchronous>, transform_indices = @transform_4, window_bounds = array<i64: 16, 16>}, {transform_indices = @transform_5, window_bounds = array<i64: 128, 16>}, {transform_indices = @transform_6, window_bounds = array<i64: 128, 16>}]} {
    %c0 = arith.constant 0 : index
    %c0_0 = arith.constant 0 : index
    %0 = vector.load %arg2[%c0, %c0_0] : memref<128x16xf32, #tpu.memory_space<vmem>>, vector<128x16xf32>
    %c0_1 = arith.constant 0 : index
    %c0_2 = arith.constant 0 : index
    %1 = vector.load %arg3[%c0_1, %c0_2] : memref<32x16xbf16, #tpu.memory_space<vmem>>, vector<32x16xbf16>
    %c128_i32 = arith.constant 128 : i32
    %2 = arith.muli %arg0, %c128_i32 : i32
    %3 = arith.truncf %0 : vector<128x16xf32> to vector<128x16xbf16>
    %cst = arith.constant dense<0.000000e+00> : vector<32x128xf32>
    %4 = tpu.matmul %1, %3, %cst {dimension_numbers = #tpu.dot_dimension_numbers<[1], [1], [0], [0], [0, 0, 1, 0], [], []>} : vector<32x16xbf16>, vector<128x16xbf16>, vector<32x128xf32> -> vector<32x128xf32>
    %5 = vector.extract_strided_slice %4 {offsets = [0, 0], sizes = [16, 128], strides = [1, 1]} : vector<32x128xf32> to vector<16x128xf32>
    %6 = vector.extract_strided_slice %4 {offsets = [16, 0], sizes = [16, 128], strides = [1, 1]} : vector<32x128xf32> to vector<16x128xf32>
    %7 = arith.mulf %5, %5 : vector<16x128xf32>
    %8 = arith.mulf %6, %6 : vector<16x128xf32>
    %9 = arith.addf %7, %8 : vector<16x128xf32>
    %10 = tpu.iota {dimensions = array<i32: 1>} : vector<16x128xi32>
    %11 = vector.broadcast %2 : i32 to vector<16x128xi32>
    %12 = arith.addi %10, %11 : vector<16x128xi32>
    %c0_i32 = arith.constant 0 : i32
    %13 = vector.broadcast %c0_i32 : i32 to vector<16x128xi32>
    %14 = arith.cmpi eq, %12, %13 : vector<16x128xi32>
    %cst_3 = arith.constant 0.000000e+00 : f32
    %15 = vector.broadcast %cst_3 : f32 to vector<16x128xf32>
    %16 = arith.select %14, %15, %9 : vector<16x128xi1>, vector<16x128xf32>
    %c0_4 = arith.constant 0 : index
    %17 = memref.load %arg1[%c0_4] : memref<1xf32, #tpu.memory_space<smem>>
    %18 = vector.broadcast %17 : f32 to vector<16x128xf32>
    %19 = arith.cmpf ogt, %16, %18 : vector<16x128xf32>
    %c0_5 = arith.constant 0 : index
    %c0_6 = arith.constant 0 : index
    %20 = vector.load %arg4[%c0_5, %c0_6] : memref<16x16xbf16, #tpu.memory_space<vmem>>, vector<16x16xbf16>
    %c0_7 = arith.constant 0 : index
    %c0_8 = arith.constant 0 : index
    %21 = vector.load %arg5[%c0_7, %c0_8] : memref<16x16xbf16, #tpu.memory_space<vmem>>, vector<16x16xbf16>
    %cst_9 = arith.constant 0.000000e+00 : f32
    %22 = vector.broadcast %cst_9 : f32 to vector<16x128xf32>
    %23 = arith.select %19, %5, %22 : vector<16x128xi1>, vector<16x128xf32>
    %24 = arith.truncf %23 : vector<16x128xf32> to vector<16x128xbf16>
    %cst_10 = arith.constant 0.000000e+00 : f32
    %25 = vector.broadcast %cst_10 : f32 to vector<16x128xf32>
    %26 = arith.select %19, %6, %25 : vector<16x128xi1>, vector<16x128xf32>
    %27 = arith.truncf %26 : vector<16x128xf32> to vector<16x128xbf16>
    %cst_11 = arith.constant dense<0.000000e+00> : vector<128x16xf32>
    %28 = tpu.matmul %24, %20, %cst_11 {dimension_numbers = #tpu.dot_dimension_numbers<[0], [0], [1], [1], [0, 1, 1, 1], [], []>} : vector<16x128xbf16>, vector<16x16xbf16>, vector<128x16xf32> -> vector<128x16xf32>
    %cst_12 = arith.constant dense<0.000000e+00> : vector<128x16xf32>
    %29 = tpu.matmul %27, %21, %cst_12 {dimension_numbers = #tpu.dot_dimension_numbers<[0], [0], [1], [1], [0, 1, 1, 1], [], []>} : vector<16x128xbf16>, vector<16x16xbf16>, vector<128x16xf32> -> vector<128x16xf32>
    %30 = arith.addf %28, %29 : vector<128x16xf32>
    %c0_13 = arith.constant 0 : index
    %c0_14 = arith.constant 0 : index
    %31 = vector.load %arg6[%c0_13, %c0_14] : memref<128x16xf32, #tpu.memory_space<vmem>>, vector<128x16xf32>
    tpu.vector_store %arg6[%c0_13, %c0_14], %30 {strides = array<i32>} : memref<128x16xf32, #tpu.memory_space<vmem>>, vector<128x16xf32>,
    %32 = arith.subf %0, %30 : vector<128x16xf32>
    %c0_15 = arith.constant 0 : index
    %c0_16 = arith.constant 0 : index
    %33 = vector.load %arg7[%c0_15, %c0_16] : memref<128x16xf32, #tpu.memory_space<vmem>>, vector<128x16xf32>
    tpu.vector_store %arg7[%c0_15, %c0_16], %32 {strides = array<i32>} : memref<128x16xf32, #tpu.memory_space<vmem>>, vector<128x16xf32>,
    return
  }
  func.func @transform_0(%arg0: i32) -> i32 {
    %c0_i32 = arith.constant 0 : i32
    %c0_i32_0 = arith.constant 0 : i32
    return %c0_i32 : i32
  }
  func.func @transform_1(%arg0: i32) -> (i32, i32) {
    %c0_i32 = arith.constant 0 : i32
    %c0_i32_0 = arith.constant 0 : i32
    return %arg0, %c0_i32 : i32, i32
  }
  func.func @transform_2(%arg0: i32) -> (i32, i32) {
    %c0_i32 = arith.constant 0 : i32
    %c0_i32_0 = arith.constant 0 : i32
    %c0_i32_1 = arith.constant 0 : i32
    return %c0_i32, %c0_i32_0 : i32, i32
  }
  func.func @transform_3(%arg0: i32) -> (i32, i32) {
    %c0_i32 = arith.constant 0 : i32
    %c0_i32_0 = arith.constant 0 : i32
    %c0_i32_1 = arith.constant 0 : i32
    return %c0_i32, %c0_i32_0 : i32, i32
  }
  func.func @transform_4(%arg0: i32) -> (i32, i32) {
    %c0_i32 = arith.constant 0 : i32
    %c0_i32_0 = arith.constant 0 : i32
    %c0_i32_1 = arith.constant 0 : i32
    return %c0_i32, %c0_i32_0 : i32, i32
  }
  func.func @transform_5(%arg0: i32) -> (i32, i32) {
    %c0_i32 = arith.constant 0 : i32
    %c0_i32_0 = arith.constant 0 : i32
    return %arg0, %c0_i32 : i32, i32
  }
  func.func @transform_6(%arg0: i32) -> (i32, i32) {
    %c0_i32 = arith.constant 0 : i32
    %c0_i32_0 = arith.constant 0 : i32
    return %arg0, %c0_i32 : i32, i32
  }
}

module attributes {stable_mosaic.version = 11 : i64} {
  func.func @_pass1_kernel(%arg0: i32, %arg1: memref<128x16xf32, #tpu.memory_space<vmem>>, %arg2: memref<32x16xbf16, #tpu.memory_space<vmem>>, %arg3: memref<1x128xf32, #tpu.memory_space<vmem>>) attributes {dimension_semantics = [#tpu.dimension_semantics<parallel>], iteration_bounds = array<i64: 1>, scalar_prefetch = 0 : i64, scratch_operands = 0 : i64, tpu.core_type = #tpu.core_type<tc>, window_params = [{transform_indices = @transform_0, window_bounds = array<i64: 128, 16>}, {pipeline_mode = #tpu.pipeline_mode<synchronous>, transform_indices = @transform_1, window_bounds = array<i64: 32, 16>}, {transform_indices = @transform_2, window_bounds = array<i64: 1, 128>}]} {
    %c0 = arith.constant 0 : index
    %c0_0 = arith.constant 0 : index
    %0 = vector.load %arg1[%c0, %c0_0] : memref<128x16xf32, #tpu.memory_space<vmem>>, vector<128x16xf32>
    %c0_1 = arith.constant 0 : index
    %c0_2 = arith.constant 0 : index
    %1 = vector.load %arg2[%c0_1, %c0_2] : memref<32x16xbf16, #tpu.memory_space<vmem>>, vector<32x16xbf16>
    %c128_i32 = arith.constant 128 : i32
    %2 = arith.muli %arg0, %c128_i32 : i32
    %3 = arith.truncf %0 : vector<128x16xf32> to vector<128x16xbf16>
    %cst = arith.constant dense<0.000000e+00> : vector<32x128xf32>
    %4 = tpu.matmul %1, %3, %cst {dimension_numbers = #tpu.dot_dimension_numbers<[1], [1], [0], [0], [0, 0, 1, 0], [], []>} : vector<32x16xbf16>, vector<128x16xbf16>, vector<32x128xf32> -> vector<32x128xf32>
    %5 = vector.extract_strided_slice %4 {offsets = [0, 0], sizes = [16, 128], strides = [1, 1]} : vector<32x128xf32> to vector<16x128xf32>
    %6 = vector.extract_strided_slice %4 {offsets = [16, 0], sizes = [16, 128], strides = [1, 1]} : vector<32x128xf32> to vector<16x128xf32>
    %7 = arith.mulf %5, %5 : vector<16x128xf32>
    %8 = arith.mulf %6, %6 : vector<16x128xf32>
    %9 = arith.addf %7, %8 : vector<16x128xf32>
    %10 = tpu.iota {dimensions = array<i32: 1>} : vector<16x128xi32>
    %11 = vector.broadcast %2 : i32 to vector<16x128xi32>
    %12 = arith.addi %10, %11 : vector<16x128xi32>
    %c0_i32 = arith.constant 0 : i32
    %13 = vector.broadcast %c0_i32 : i32 to vector<16x128xi32>
    %14 = arith.cmpi eq, %12, %13 : vector<16x128xi32>
    %cst_3 = arith.constant 0.000000e+00 : f32
    %15 = vector.broadcast %cst_3 : f32 to vector<16x128xf32>
    %16 = arith.select %14, %15, %9 : vector<16x128xi1>, vector<16x128xf32>
    %17 = tpu.iota {dimensions = array<i32: 0>} : vector<16x128xi32>
    %cst_4 = arith.constant dense<0xFF800000> : vector<128xf32>
    %18 = vector.multi_reduction <maximumf>, %16, %cst_4 [0] : vector<16x128xf32> to vector<128xf32>
    %19 = vector.shape_cast %18 : vector<128xf32> to vector<1x128xf32>
    %20 = vector.broadcast %19 : vector<1x128xf32> to vector<16x128xf32>
    %21 = arith.cmpf oeq, %16, %20 : vector<16x128xf32>
    %c16_i32 = arith.constant 16 : i32
    %22 = vector.broadcast %c16_i32 : i32 to vector<16x128xi32>
    %23 = arith.select %21, %17, %22 : vector<16x128xi1>, vector<16x128xi32>
    %cst_5 = arith.constant dense<2147483647> : vector<128xi32>
    %24 = vector.multi_reduction <minsi>, %23, %cst_5 [0] : vector<16x128xi32> to vector<128xi32>
    %25 = vector.shape_cast %24 : vector<128xi32> to vector<1x128xi32>
    %26 = vector.broadcast %25 : vector<1x128xi32> to vector<16x128xi32>
    %27 = arith.cmpi eq, %17, %26 : vector<16x128xi32>
    %cst_6 = arith.constant 0xFF800000 : f32
    %28 = vector.broadcast %cst_6 : f32 to vector<16x128xf32>
    %29 = arith.select %27, %28, %16 : vector<16x128xi1>, vector<16x128xf32>
    %cst_7 = arith.constant dense<0xFF800000> : vector<128xf32>
    %30 = vector.multi_reduction <maximumf>, %29, %cst_7 [0] : vector<16x128xf32> to vector<128xf32>
    %31 = vector.shape_cast %30 : vector<128xf32> to vector<1x128xf32>
    %32 = vector.broadcast %31 : vector<1x128xf32> to vector<16x128xf32>
    %33 = arith.cmpf oeq, %29, %32 : vector<16x128xf32>
    %c16_i32_8 = arith.constant 16 : i32
    %34 = vector.broadcast %c16_i32_8 : i32 to vector<16x128xi32>
    %35 = arith.select %33, %17, %34 : vector<16x128xi1>, vector<16x128xi32>
    %cst_9 = arith.constant dense<2147483647> : vector<128xi32>
    %36 = vector.multi_reduction <minsi>, %35, %cst_9 [0] : vector<16x128xi32> to vector<128xi32>
    %37 = vector.shape_cast %36 : vector<128xi32> to vector<1x128xi32>
    %38 = vector.broadcast %37 : vector<1x128xi32> to vector<16x128xi32>
    %39 = arith.cmpi eq, %17, %38 : vector<16x128xi32>
    %cst_10 = arith.constant 0xFF800000 : f32
    %40 = vector.broadcast %cst_10 : f32 to vector<16x128xf32>
    %41 = arith.select %39, %40, %29 : vector<16x128xi1>, vector<16x128xf32>
    %cst_11 = arith.constant dense<0xFF800000> : vector<128xf32>
    %42 = vector.multi_reduction <maximumf>, %41, %cst_11 [0] : vector<16x128xf32> to vector<128xf32>
    %43 = vector.shape_cast %42 : vector<128xf32> to vector<1x128xf32>
    %44 = vector.broadcast %43 : vector<1x128xf32> to vector<16x128xf32>
    %45 = arith.cmpf oeq, %41, %44 : vector<16x128xf32>
    %c16_i32_12 = arith.constant 16 : i32
    %46 = vector.broadcast %c16_i32_12 : i32 to vector<16x128xi32>
    %47 = arith.select %45, %17, %46 : vector<16x128xi1>, vector<16x128xi32>
    %cst_13 = arith.constant dense<2147483647> : vector<128xi32>
    %48 = vector.multi_reduction <minsi>, %47, %cst_13 [0] : vector<16x128xi32> to vector<128xi32>
    %49 = vector.shape_cast %48 : vector<128xi32> to vector<1x128xi32>
    %50 = vector.broadcast %49 : vector<1x128xi32> to vector<16x128xi32>
    %51 = arith.cmpi eq, %17, %50 : vector<16x128xi32>
    %cst_14 = arith.constant 0xFF800000 : f32
    %52 = vector.broadcast %cst_14 : f32 to vector<16x128xf32>
    %53 = arith.select %51, %52, %41 : vector<16x128xi1>, vector<16x128xf32>
    %cst_15 = arith.constant dense<0xFF800000> : vector<128xf32>
    %54 = vector.multi_reduction <maximumf>, %53, %cst_15 [0] : vector<16x128xf32> to vector<128xf32>
    %55 = vector.shape_cast %54 : vector<128xf32> to vector<1x128xf32>
    %56 = vector.broadcast %55 : vector<1x128xf32> to vector<16x128xf32>
    %57 = arith.cmpf oeq, %53, %56 : vector<16x128xf32>
    %c16_i32_16 = arith.constant 16 : i32
    %58 = vector.broadcast %c16_i32_16 : i32 to vector<16x128xi32>
    %59 = arith.select %57, %17, %58 : vector<16x128xi1>, vector<16x128xi32>
    %cst_17 = arith.constant dense<2147483647> : vector<128xi32>
    %60 = vector.multi_reduction <minsi>, %59, %cst_17 [0] : vector<16x128xi32> to vector<128xi32>
    %61 = vector.shape_cast %60 : vector<128xi32> to vector<1x128xi32>
    %62 = vector.broadcast %61 : vector<1x128xi32> to vector<16x128xi32>
    %63 = arith.cmpi eq, %17, %62 : vector<16x128xi32>
    %cst_18 = arith.constant 0xFF800000 : f32
    %64 = vector.broadcast %cst_18 : f32 to vector<16x128xf32>
    %65 = arith.select %63, %64, %53 : vector<16x128xi1>, vector<16x128xf32>
    %cst_19 = arith.constant dense<0xFF800000> : vector<128xf32>
    %66 = vector.multi_reduction <maximumf>, %65, %cst_19 [0] : vector<16x128xf32> to vector<128xf32>
    %67 = vector.shape_cast %66 : vector<128xf32> to vector<1x128xf32>
    %c0_20 = arith.constant 0 : index
    %c0_21 = arith.constant 0 : index
    %68 = vector.load %arg3[%c0_20, %c0_21] : memref<1x128xf32, #tpu.memory_space<vmem>>, vector<1x128xf32>
    tpu.vector_store %arg3[%c0_20, %c0_21], %67 {strides = array<i32>} : memref<1x128xf32, #tpu.memory_space<vmem>>, vector<1x128xf32>,
    return
  }
  func.func @transform_0(%arg0: i32) -> (i32, i32) {
    %c0_i32 = arith.constant 0 : i32
    %c0_i32_0 = arith.constant 0 : i32
    return %arg0, %c0_i32 : i32, i32
  }
  func.func @transform_1(%arg0: i32) -> (i32, i32) {
    %c0_i32 = arith.constant 0 : i32
    %c0_i32_0 = arith.constant 0 : i32
    %c0_i32_1 = arith.constant 0 : i32
    return %c0_i32, %c0_i32_0 : i32, i32
  }
  func.func @transform_2(%arg0: i32) -> (i32, i32) {
    %c0_i32 = arith.constant 0 : i32
    %c0_i32_0 = arith.constant 0 : i32
    return %c0_i32, %arg0 : i32, i32
  }
}

</mosaic_0001>

<bundles_post_ra>
// kernel: dft_series_decomp.2
= control target key start
LH: loop header
LB: loop body
LE: loop exit
PB: predicated region body
PF: predicated region fallthrough
CT: control target
= control target key end

     0   :  { %vm51_vm0 = vcmask 130048   ;;  %v137_v35 = vlaneseq  ;;  %s418_s0 = inlined_call_operand.vmem [shape: f32[128,16], index: 0, kind: input, shape index: {}]   ;;  %s419_s1 = inlined_call_operand.vmem [shape: bf16[32,16], index: 1, kind: input, shape index: {}]   ;;  %s420_s2 = inlined_call_operand.vmem [shape: f32[1,128], index: 2, kind: output, shape index: {}]  }
   0x1   :  { %v26_v0 = vld [vmem:[%s418_s0 + $0x70] sm:$0xff]  ;;  %v27_v1 = vld [vmem:[%s418_s0 + $0x78] sm:$0xff]  ;;  %v24_v2 = vld [vmem:[%s418_s0 + $0x60] sm:$0xff] }
   0x2   :  { %v40_v3 = vpack.c.bf16 %v27_v1, %v26_v0  ;;  %v25_v4 = vld [vmem:[%s418_s0 + $0x68] sm:$0xff]  ;;  %v22_v7 = vld [vmem:[%s418_s0 + $0x50] sm:$0xff]  ;;  %v23_v8 = vld [vmem:[%s418_s0 + $0x58] sm:$0xff]  ;;  %v138_v38 = vand.u32 127, %v137_v35  ;;  %v394_v52 = vshrl.u32 %v137_v35, 7 }
   0x3   :  { %v39_v5 = vpack.c.bf16 %v25_v4, %v24_v2  ;;  %v305_v9 = vld [vmem:[%s419_s1] sm:$0xff]   ;;  %v38_v11 = vpack.c.bf16 %v23_v8, %v22_v7  ;;  %v21_v13 = vld [vmem:[%s418_s0 + $0x48] sm:$0xff]  ;;  %v18_v16 = vld [vmem:[%s418_s0 + $0x30] sm:$0xff] }
   0x4   :  { %297 = vmatprep.subr.msk.bf16.mxu0 %vm51_vm0, %v40_v3  ;;  %v80_v6 = vsel %vm51_vm0, %v40_v3, 0  ;;  %293 = vmatprep.mubr.msk.bf16.mxu0 %vm51_vm0, %v305_v9  ;;  %v20_v12 = vld [vmem:[%s418_s0 + $0x40] sm:$0xff]  ;;  %v19_v17 = vld [vmem:[%s418_s0 + $0x38] sm:$0xff]  ;;  %v17_v21 = vld [vmem:[%s418_s0 + $0x28] sm:$0xff]  ;;  %vm141_vm1 = vcmp.eq.s32.totalorder %v138_v38, 0  ;;  %v397_v55 = vadd.s32 8, %v394_v52 }
   0x5   :  { %278 = vmatpush3.bf16.xpose.msra.mxu0 %v80_v6  ;;  %v77_v10 = vsel %vm51_vm0, %v39_v5, 0  ;;  %v74_v14 = vsel %vm51_vm0, %v38_v11, 0  ;;  %v37_v15 = vpack.c.bf16 %v21_v13, %v20_v12  ;;  %v36_v19 = vpack.c.bf16 %v19_v17, %v18_v16  ;;  %v16_v20 = vld [vmem:[%s418_s0 + $0x20] sm:$0xff]  ;;  %v14_v24 = vld [vmem:[%s418_s0 + $0x10] sm:$0xff]  ;;  %v15_v25 = vld [vmem:[%s418_s0 + $0x18] sm:$0xff] }
   0x6   :  { %298 = vmatprep.subr.msk.bf16.mxu0 %vm51_vm0, %v39_v5  ;;  %v35_v23 = vpack.c.bf16 %v17_v21, %v16_v20  ;;  %v34_v27 = vpack.c.bf16 %v15_v25, %v14_v24  ;;  %v12_v28 = vld [vmem:[%s418_s0] sm:$0xff]  ;;  %v13_v29 = vld [vmem:[%s418_s0 + $0x8] sm:$0xff] }
   0x7   :  { %v71_v18 = vsel %vm51_vm0, %v37_v15, 0  ;;  %v68_v22 = vsel %vm51_vm0, %v36_v19, 0  ;;  %v33_v31 = vpack.c.bf16 %v13_v29, %v12_v28  ;;  %v306_v33 = vld [vmem:[%s419_s1 + $0x8] sm:$0xff]  }
   0x8   :  { %v65_v26 = vsel %vm51_vm0, %v35_v23, 0  ;;  %v62_v30 = vsel %vm51_vm0, %v34_v27, 0 }
   0x9   :  { %v59_v32 = vsel %vm51_vm0, %v33_v31, 0 }
   0xd   :  { %280 = vmatpush3.bf16.xpose.msra.mxu0 %v77_v10 }
   0xe   :  { %299 = vmatprep.subr.msk.bf16.mxu0 %vm51_vm0, %v38_v11 }
  0x15   :  { %282 = vmatpush3.bf16.xpose.msra.mxu0 %v74_v14 }
  0x16   :  { %300 = vmatprep.subr.msk.bf16.mxu0 %vm51_vm0, %v37_v15 }
  0x1d   :  { %284 = vmatpush3.bf16.xpose.msra.mxu0 %v71_v18 }
  0x1e   :  { %301 = vmatprep.subr.msk.bf16.mxu0 %vm51_vm0, %v36_v19 }
  0x25   :  { %286 = vmatpush3.bf16.xpose.msra.mxu0 %v68_v22 }
  0x26   :  { %302 = vmatprep.subr.msk.bf16.mxu0 %vm51_vm0, %v35_v23 }
  0x2d   :  { %288 = vmatpush3.bf16.xpose.msra.mxu0 %v65_v26 }
  0x2e   :  { %303 = vmatprep.subr.msk.bf16.mxu0 %vm51_vm0, %v34_v27 }
  0x35   :  { %290 = vmatpush3.bf16.xpose.msra.mxu0 %v62_v30 }
  0x36   :  { %304 = vmatprep.subr.msk.bf16.mxu0 %vm51_vm0, %v33_v31 }
  0x3d   :  { %292 = vmatpush3.bf16.xpose.msra.mxu0 %v59_v32 }
  0x44   :  { %294 = vmatmul.mubr.msk.bf16.vlgmr.msra.gmra.mxu0 %vm51_vm0, %v306_v33 }
 0x104   :  { %v295_v34 = vpop.f32.mrf.mxu0 }
 0x105   :  { %v133_v40 = vmul.f32 %v295_v34, %v295_v34 }
 0x106   :  { %v116_v36 = vpop.f32.mrf.mxu0 }
 0x107   :  { %v131_v37 = vmul.f32 %v116_v36, %v116_v36 }
 0x108   :  { %v296_v39 = vpop.f32.mrf.mxu0 }
 0x109   :  { %v135_v42 = vadd.f32 %v133_v40, %v131_v37  ;;  %v134_v43 = vmul.f32 %v296_v39, %v296_v39 }
 0x10a   :  { %v119_v41 = vpop.f32.mrf.mxu0 }
 0x10b   :  { %v132_v44 = vmul.f32 %v119_v41, %v119_v41  ;;  %v142_v46 = vsel %vm141_vm1, 0.0, %v135_v42 }
 0x10d   :  { %v136_v45 = vadd.f32 %v134_v43, %v132_v44 }
 0x10f   :  { %v143_v47 = vsel %vm141_vm1, 0.0, %v136_v45 }
 0x110   :  { %v147_v48 = vmax.f32 %v142_v46, %v143_v47 }
 0x112   :  { %v148_v49 = vrot.slane %v147_v48, 4 }
 0x114   :  { %v149_v50 = vmax.f32 %v147_v48, %v148_v49 }
 0x116   :  { %v150_v51 = vrot.slane %v149_v50, 2 }
 0x118   :  { %v151_v53 = vmax.f32 %v149_v50, %v150_v51 }
 0x11a   :  { %v152_v54 = vrot.slane %v151_v53, 1 }
 0x11c   :  { %v153_v56 = vmax.f32 %v151_v53, %v152_v54 }
 0x11e   :  { %vm154_vm2 = vcmp.eq.f32.partialorder %v142_v46, %v153_v56  ;;  %vm155_vm3 = vcmp.eq.f32.partialorder %v143_v47, %v153_v56 }
 0x11f   :  { %v156_v57 = vsel %vm154_vm2, %v394_v52, 16  ;;  %v157_v58 = vsel %vm155_vm3, %v397_v55, 16 }
 0x120   :  { %vm158_vm4 = vcmp.lt.s32.totalorder %v156_v57, %v157_v58 }
 0x121   :  { %v159_v59 = vsel %vm158_vm4, %v156_v57, %v157_v58 }
 0x122   :  { %v160_v60 = vrot.slane %v159_v59, 4 }
 0x124   :  { %vm161_vm5 = vcmp.lt.s32.totalorder %v159_v59, %v160_v60 }
 0x125   :  { %v162_v61 = vsel %vm161_vm5, %v159_v59, %v160_v60 }
 0x126   :  { %v163_v62 = vrot.slane %v162_v61, 2 }
 0x128   :  { %vm164_vm6 = vcmp.lt.s32.totalorder %v162_v61, %v163_v62 }
 0x129   :  { %v165_v63 = vsel %vm164_vm6, %v162_v61, %v163_v62 }
 0x12a   :  { %v166_v0 = vrot.slane %v165_v63, 1 }
 0x12c   :  { %vm167_vm7 = vcmp.lt.s32.totalorder %v165_v63, %v166_v0 }
 0x12d   :  { %v168_v1 = vsel %vm167_vm7, %v165_v63, %v166_v0 }
 0x12e   :  { %vm169_vm8 = vcmp.eq.s32.totalorder %v394_v52, %v168_v1  ;;  %vm170_vm9 = vcmp.eq.s32.totalorder %v397_v55, %v168_v1 }
 0x12f   :  { %v171_v2 = vsel %vm169_vm8, -inf, %v142_v46  ;;  %v172_v3 = vsel %vm170_vm9, -inf, %v143_v47 }
 0x130   :  { %v173_v4 = vmax.f32 %v171_v2, %v172_v3 }
 0x132   :  { %v174_v5 = vrot.slane %v173_v4, 4 }
 0x134   :  { %v175_v6 = vmax.f32 %v173_v4, %v174_v5 }
 0x136   :  { %v176_v7 = vrot.slane %v175_v6, 2 }
 0x138   :  { %v177_v8 = vmax.f32 %v175_v6, %v176_v7 }
 0x13a   :  { %v178_v9 = vrot.slane %v177_v8, 1 }
 0x13c   :  { %v179_v10 = vmax.f32 %v177_v8, %v178_v9 }
 0x13e   :  { %vm180_vm10 = vcmp.eq.f32.partialorder %v171_v2, %v179_v10  ;;  %vm181_vm11 = vcmp.eq.f32.partialorder %v172_v3, %v179_v10 }
 0x13f   :  { %v182_v11 = vsel %vm180_vm10, %v394_v52, 16  ;;  %v183_v12 = vsel %vm181_vm11, %v397_v55, 16 }
 0x140   :  { %vm184_vm12 = vcmp.lt.s32.totalorder %v182_v11, %v183_v12 }
 0x141   :  { %v185_v13 = vsel %vm184_vm12, %v182_v11, %v183_v12 }
 0x142   :  { %v186_v14 = vrot.slane %v185_v13, 4 }
 0x144   :  { %vm187_vm13 = vcmp.lt.s32.totalorder %v185_v13, %v186_v14 }
 0x145   :  { %v188_v15 = vsel %vm187_vm13, %v185_v13, %v186_v14 }
 0x146   :  { %v189_v16 = vrot.slane %v188_v15, 2 }
 0x148   :  { %vm190_vm14 = vcmp.lt.s32.totalorder %v188_v15, %v189_v16 }
 0x149   :  { %v191_v17 = vsel %vm190_vm14, %v188_v15, %v189_v16 }
 0x14a   :  { %v192_v18 = vrot.slane %v191_v17, 1 }
 0x14c   :  { %vm193_vm15 = vcmp.lt.s32.totalorder %v191_v17, %v192_v18 }
 0x14d   :  { %v194_v19 = vsel %vm193_vm15, %v191_v17, %v192_v18 }
 0x14e   :  { %vm195_vm0 = vcmp.eq.s32.totalorder %v394_v52, %v194_v19  ;;  %vm196_vm1 = vcmp.eq.s32.totalorder %v397_v55, %v194_v19 }
 0x14f   :  { %v197_v20 = vsel %vm195_vm0, -inf, %v171_v2  ;;  %v198_v21 = vsel %vm196_vm1, -inf, %v172_v3 }
 0x150   :  { %v199_v22 = vmax.f32 %v197_v20, %v198_v21 }
 0x152   :  { %v200_v23 = vrot.slane %v199_v22, 4 }
 0x154   :  { %v201_v24 = vmax.f32 %v199_v22, %v200_v23 }
 0x156   :  { %v202_v25 = vrot.slane %v201_v24, 2 }
 0x158   :  { %v203_v26 = vmax.f32 %v201_v24, %v202_v25 }
 0x15a   :  { %v204_v27 = vrot.slane %v203_v26, 1 }
 0x15c   :  { %v205_v28 = vmax.f32 %v203_v26, %v204_v27 }
 0x15e   :  { %vm206_vm2 = vcmp.eq.f32.partialorder %v197_v20, %v205_v28  ;;  %vm207_vm3 = vcmp.eq.f32.partialorder %v198_v21, %v205_v28 }
 0x15f   :  { %v208_v29 = vsel %vm206_vm2, %v394_v52, 16  ;;  %v209_v30 = vsel %vm207_vm3, %v397_v55, 16 }
 0x160   :  { %vm210_vm4 = vcmp.lt.s32.totalorder %v208_v29, %v209_v30 }
 0x161   :  { %v211_v31 = vsel %vm210_vm4, %v208_v29, %v209_v30 }
 0x162   :  { %v212_v32 = vrot.slane %v211_v31, 4 }
 0x164   :  { %vm213_vm5 = vcmp.lt.s32.totalorder %v211_v31, %v212_v32 }
 0x165   :  { %v214_v33 = vsel %vm213_vm5, %v211_v31, %v212_v32 }
 0x166   :  { %v215_v34 = vrot.slane %v214_v33, 2 }
 0x168   :  { %vm216_vm6 = vcmp.lt.s32.totalorder %v214_v33, %v215_v34 }
 0x169   :  { %v217_v35 = vsel %vm216_vm6, %v214_v33, %v215_v34 }
 0x16a   :  { %v218_v36 = vrot.slane %v217_v35, 1 }
 0x16c   :  { %vm219_vm7 = vcmp.lt.s32.totalorder %v217_v35, %v218_v36 }
 0x16d   :  { %v220_v37 = vsel %vm219_vm7, %v217_v35, %v218_v36 }
 0x16e   :  { %vm221_vm8 = vcmp.eq.s32.totalorder %v394_v52, %v220_v37  ;;  %vm222_vm9 = vcmp.eq.s32.totalorder %v397_v55, %v220_v37 }
 0x16f   :  { %v223_v38 = vsel %vm221_vm8, -inf, %v197_v20  ;;  %v224_v39 = vsel %vm222_vm9, -inf, %v198_v21 }
 0x170   :  { %v225_v40 = vmax.f32 %v223_v38, %v224_v39 }
 0x172   :  { %v226_v41 = vrot.slane %v225_v40, 4 }
 0x174   :  { %v227_v42 = vmax.f32 %v225_v40, %v226_v41 }
 0x176   :  { %v228_v43 = vrot.slane %v227_v42, 2 }
 0x178   :  { %v229_v44 = vmax.f32 %v227_v42, %v228_v43 }
 0x17a   :  { %v230_v45 = vrot.slane %v229_v44, 1 }
 0x17c   :  { %v231_v46 = vmax.f32 %v229_v44, %v230_v45 }
 0x17e   :  { %vm232_vm10 = vcmp.eq.f32.partialorder %v223_v38, %v231_v46  ;;  %vm233_vm11 = vcmp.eq.f32.partialorder %v224_v39, %v231_v46 }
 0x17f   :  { %v234_v47 = vsel %vm232_vm10, %v394_v52, 16  ;;  %v235_v48 = vsel %vm233_vm11, %v397_v55, 16 }
 0x180   :  { %vm236_vm12 = vcmp.lt.s32.totalorder %v234_v47, %v235_v48 }
 0x181   :  { %v237_v49 = vsel %vm236_vm12, %v234_v47, %v235_v48 }
 0x182   :  { %v238_v50 = vrot.slane %v237_v49, 4 }
 0x184   :  { %vm239_vm13 = vcmp.lt.s32.totalorder %v237_v49, %v238_v50 }
 0x185   :  { %v240_v51 = vsel %vm239_vm13, %v237_v49, %v238_v50 }
 0x186   :  { %v241_v53 = vrot.slane %v240_v51, 2 }
 0x188   :  { %vm242_vm14 = vcmp.lt.s32.totalorder %v240_v51, %v241_v53 }
 0x189   :  { %v243_v54 = vsel %vm242_vm14, %v240_v51, %v241_v53 }
 0x18a   :  { %v244_v56 = vrot.slane %v243_v54, 1 }
 0x18c   :  { %vm245_vm15 = vcmp.lt.s32.totalorder %v243_v54, %v244_v56 }
 0x18d   :  { %v246_v57 = vsel %vm245_vm15, %v243_v54, %v244_v56 }
 0x18e   :  { %vm247_vm0 = vcmp.eq.s32.totalorder %v394_v52, %v246_v57  ;;  %vm248_vm1 = vcmp.eq.s32.totalorder %v397_v55, %v246_v57 }
 0x18f   :  { %v249_v58 = vsel %vm247_vm0, -inf, %v223_v38  ;;  %v250_v59 = vsel %vm248_vm1, -inf, %v224_v39 }
 0x190   :  { %v251_v60 = vmax.f32 %v249_v58, %v250_v59 }
 0x192   :  { %v252_v61 = vrot.slane %v251_v60, 4 }
 0x194   :  { %v253_v62 = vmax.f32 %v251_v60, %v252_v61 }
 0x196   :  { %v254_v63 = vrot.slane %v253_v62, 2 }
 0x198   :  { %v255_v0 = vmax.f32 %v253_v62, %v254_v63 }
 0x19a   :  { %v256_v1 = vrot.slane %v255_v0, 1 }
 0x19c   :  { %v257_v2 = vmax.f32 %v255_v0, %v256_v1 }
 0x19e   :  { %258 = vst [vmem:[%s420_s2] sm:$0x1] %v257_v2 }

// kernel: dft_series_decomp.3
= control target key start
LH: loop header
LB: loop body
LE: loop exit
PB: predicated region body
PF: predicated region fallthrough
CT: control target
= control target key end

     0   :  { %vm63_vm0 = vcmask 130048   ;;  %v149_v36 = vlaneseq  ;;  %s967_s1 = inlined_call_operand.vmem [shape: f32[128,16], index: 1, kind: input, shape index: {}]   ;;  %s968_s2 = inlined_call_operand.vmem [shape: bf16[32,16], index: 2, kind: input, shape index: {}]   ;;  %s969_s4 = inlined_call_operand.vmem [shape: bf16[16,16], index: 4, kind: input, shape index: {}]   ;;  %s970_s3 = inlined_call_operand.vmem [shape: bf16[16,16], index: 3, kind: input, shape index: {}]   ;;  %s971_s0 = inlined_call_operand.<no memory space> [shape: f32[1], index: 0, kind: input, shape index: {}]   ;;  %s972_s5 = inlined_call_operand.vmem [shape: f32[128,16], index: 5, kind: output, shape index: {0}]   ;;  %s973_s6 = inlined_call_operand.vmem [shape: f32[128,16], index: 6, kind: output, shape index: {1}]  }
   0x1   :  { %v669_v0 = vld [vmem:[%s967_s1 + $0x70] sm:$0xff]  ;;  %v674_v1 = vld [vmem:[%s967_s1 + $0x78] sm:$0xff]  ;;  %v679_v2 = vld [vmem:[%s967_s1 + $0x60] sm:$0xff]  ;;  %v157_v46 = vstv %s971_s0 }
   0x2   :  { %v52_v3 = vpack.c.bf16 %v674_v1, %v669_v0  ;;  %v686_v4 = vld [vmem:[%s967_s1 + $0x68] sm:$0xff]  ;;  %v696_v7 = vld [vmem:[%s967_s1 + $0x50] sm:$0xff]  ;;  %v701_v8 = vld [vmem:[%s967_s1 + $0x58] sm:$0xff]  ;;  %v150_v38 = vand.u32 127, %v149_v36 }
   0x3   :  { %v51_v5 = vpack.c.bf16 %v686_v4, %v679_v2  ;;  %v627_v9 = vld [vmem:[%s968_s2] sm:$0xff]   ;;  %v50_v11 = vpack.c.bf16 %v701_v8, %v696_v7  ;;  %v719_v13 = vld [vmem:[%s967_s1 + $0x48] sm:$0xff]  ;;  %v728_v16 = vld [vmem:[%s967_s1 + $0x30] sm:$0xff] }
   0x4   :  { %618 = vmatprep.subr.msk.bf16.mxu0 %vm63_vm0, %v52_v3  ;;  %v92_v6 = vsel %vm63_vm0, %v52_v3, 0  ;;  %578 = vmatprep.mubr.msk.bf16.mxu0 %vm63_vm0, %v627_v9  ;;  %v714_v12 = vld [vmem:[%s967_s1 + $0x40] sm:$0xff]  ;;  %v733_v17 = vld [vmem:[%s967_s1 + $0x38] sm:$0xff]  ;;  %v747_v21 = vld [vmem:[%s967_s1 + $0x28] sm:$0xff]  ;;  %vm153_vm1 = vcmp.eq.s32.totalorder %v150_v38, 0 }
   0x5   :  { %563 = vmatpush3.bf16.xpose.msra.mxu0 %v92_v6  ;;  %v89_v10 = vsel %vm63_vm0, %v51_v5, 0  ;;  %v86_v14 = vsel %vm63_vm0, %v50_v11, 0  ;;  %v49_v15 = vpack.c.bf16 %v719_v13, %v714_v12  ;;  %v48_v19 = vpack.c.bf16 %v733_v17, %v728_v16  ;;  %v742_v20 = vld [vmem:[%s967_s1 + $0x20] sm:$0xff]  ;;  %v756_v24 = vld [vmem:[%s967_s1 + $0x10] sm:$0xff]  ;;  %v761_v25 = vld [vmem:[%s967_s1 + $0x18] sm:$0xff] }
   0x6   :  { %619 = vmatprep.subr.msk.bf16.mxu0 %vm63_vm0, %v51_v5  ;;  %v47_v23 = vpack.c.bf16 %v747_v21, %v742_v20  ;;  %v46_v27 = vpack.c.bf16 %v761_v25, %v756_v24  ;;  %v770_v28 = vld [vmem:[%s967_s1] sm:$0xff]  ;;  %v775_v29 = vld [vmem:[%s967_s1 + $0x8] sm:$0xff] }
   0x7   :  { %v83_v18 = vsel %vm63_vm0, %v49_v15, 0  ;;  %v80_v22 = vsel %vm63_vm0, %v48_v19, 0  ;;  %v45_v31 = vpack.c.bf16 %v775_v29, %v770_v28  ;;  %v628_v33 = vld [vmem:[%s968_s2 + $0x8] sm:$0xff]   ;;  %v629_v34 = vld [vmem:[%s969_s4] sm:$0xff]  }
   0x8   :  { %v77_v26 = vsel %vm63_vm0, %v47_v23, 0  ;;  %v74_v30 = vsel %vm63_vm0, %v46_v27, 0  ;;  %582 = vmatprep.subr.bf16.mxu1 %v629_v34  ;;  %v630_v35 = vld [vmem:[%s970_s3] sm:$0xff]  }
   0x9   :  { %v71_v32 = vsel %vm63_vm0, %v45_v31, 0  ;;  %583 = vmatpush3.bf16.msra.mxu1 %v629_v34 }
   0xa   :  { %600 = vmatprep.subr.bf16.mxu1 %v630_v35 }
   0xd   :  { %565 = vmatpush3.bf16.xpose.msra.mxu0 %v89_v10 }
   0xe   :  { %620 = vmatprep.subr.msk.bf16.mxu0 %vm63_vm0, %v50_v11 }
  0x15   :  { %567 = vmatpush3.bf16.xpose.msra.mxu0 %v86_v14 }
  0x16   :  { %621 = vmatprep.subr.msk.bf16.mxu0 %vm63_vm0, %v49_v15 }
  0x1d   :  { %569 = vmatpush3.bf16.xpose.msra.mxu0 %v83_v18 }
  0x1e   :  { %622 = vmatprep.subr.msk.bf16.mxu0 %vm63_vm0, %v48_v19 }
  0x25   :  { %571 = vmatpush3.bf16.xpose.msra.mxu0 %v80_v22 }
  0x26   :  { %623 = vmatprep.subr.msk.bf16.mxu0 %vm63_vm0, %v47_v23 }
  0x2d   :  { %573 = vmatpush3.bf16.xpose.msra.mxu0 %v77_v26 }
  0x2e   :  { %624 = vmatprep.subr.msk.bf16.mxu0 %vm63_vm0, %v46_v27 }
  0x35   :  { %575 = vmatpush3.bf16.xpose.msra.mxu0 %v74_v30 }
  0x36   :  { %625 = vmatprep.subr.msk.bf16.mxu0 %vm63_vm0, %v45_v31 }
  0x3d   :  { %577 = vmatpush3.bf16.xpose.msra.mxu0 %v71_v32 }
  0x44   :  { %579 = vmatmul.mubr.msk.bf16.vlgmr.msra.gmra.mxu0 %vm63_vm0, %v628_v33 }
 0x104   :  { %v580_v37 = vpop.f32.mrf.mxu0 }
 0x105   :  { %v145_v40 = vmul.f32 %v580_v37, %v580_v37 }
 0x106   :  { %v128_v39 = vpop.f32.mrf.mxu0 }
 0x107   :  { %v143_v41 = vmul.f32 %v128_v39, %v128_v39 }
 0x108   :  { %v581_v42 = vpop.f32.mrf.mxu0 }
 0x109   :  { %v147_v43 = vadd.f32 %v145_v40, %v143_v41  ;;  %v146_v47 = vmul.f32 %v581_v42, %v581_v42 }
 0x10a   :  { %v131_v44 = vpop.f32.mrf.mxu0 }
 0x10b   :  { %v154_v45 = vsel %vm153_vm1, 0.0, %v147_v43  ;;  %v144_v48 = vmul.f32 %v131_v44, %v131_v44 }
 0x10c   :  { %vm158_vm2 = vcmp.gt.f32.partialorder %v154_v45, %v157_v46 }
 0x10d   :  { %v148_v49 = vadd.f32 %v146_v47, %v144_v48  ;;  %v167_v51 = vsel %vm158_vm2, %v580_v37, 0.0  ;;  %v164_v55 = vsel %vm158_vm2, %v128_v39, 0.0 }
 0x10f   :  { %v155_v50 = vsel %vm153_vm1, 0.0, %v148_v49 }
 0x110   :  { %vm159_vm3 = vcmp.gt.f32.partialorder %v155_v50, %v157_v46 }
 0x111   :  { %v168_v52 = vsel %vm159_vm3, %v581_v42, 0.0  ;;  %v165_v54 = vsel %vm159_vm3, %v131_v44, 0.0 }
 0x112   :  { %v169_v53 = vpack.c.bf16 %v168_v52, %v167_v51  ;;  %v166_v56 = vpack.c.bf16 %v165_v54, %v164_v55 }
 0x114   :  { %170 = vxpose.xlu0.c.b16.start.end [1/1] (short) %v169_v53, 128 }
 0x131   :  { %313 = vxpose.xlu0.c.b16.start.end [1/1] (short) %v166_v56, 128 }
 0x176   :  { %v178_v57 = vpop.trf.xlu0 }
 0x177   :  { %584 = vmatprep.mubr.msk.bf16.mxu1 %vm63_vm0, %v178_v57 }
 0x17a   :  { %v179_v58 = vpop.trf.xlu0 }
 0x17b   :  { %585 = vmatmul.mubr.msk.bf16.vlgmr.msra.gmra.mxu1 %vm63_vm0, %v179_v58 }
 0x17c   :  { %601 = vmatpush3.bf16.msra.mxu1 %v630_v35 }
 0x17e   :  { %v180_v59 = vpop.trf.xlu0 }
 0x17f   :  { %588 = vmatprep.mubr.msk.bf16.mxu1 %vm63_vm0, %v180_v59 }
 0x182   :  { %v181_v60 = vpop.trf.xlu0 }
 0x183   :  { %589 = vmatmul.mubr.msk.bf16.gmra.mxu1 %vm63_vm0, %v181_v60 }
 0x186   :  { %v182_v61 = vpop.trf.xlu0 }
 0x187   :  { %592 = vmatprep.mubr.msk.bf16.mxu1 %vm63_vm0, %v182_v61 }
 0x18a   :  { %v183_v62 = vpop.trf.xlu0 }
 0x18b   :  { %593 = vmatmul.mubr.msk.bf16.gmra.mxu1 %vm63_vm0, %v183_v62 }
 0x18e   :  { %v184_v63 = vpop.trf.xlu0 }
 0x18f   :  { %596 = vmatprep.mubr.msk.bf16.mxu1 %vm63_vm0, %v184_v63 }
 0x192   :  { %v185_v3 = vpop.trf.xlu0 }
 0x193   :  { %597 = vmatmul.mubr.msk.bf16.gmra.mxu1 %vm63_vm0, %v185_v3 }
 0x196   :  { %v321_v5 = vpop.trf.xlu0 }
 0x197   :  { %602 = vmatprep.mubr.msk.bf16.mxu1 %vm63_vm0, %v321_v5 }
 0x19a   :  { %v322_v6 = vpop.trf.xlu0 }
 0x19b   :  { %603 = vmatmul.mubr.msk.bf16.vlgmr.msra.gmra.mxu1 %vm63_vm0, %v322_v6 }
 0x19e   :  { %v323_v9 = vpop.trf.xlu0 }
 0x19f   :  { %606 = vmatprep.mubr.msk.bf16.mxu1 %vm63_vm0, %v323_v9 }
 0x1a2   :  { %v324_v10 = vpop.trf.xlu0 }
 0x1a3   :  { %607 = vmatmul.mubr.msk.bf16.gmra.mxu1 %vm63_vm0, %v324_v10 }
 0x1a6   :  { %v325_v11 = vpop.trf.xlu0 }
 0x1a7   :  { %610 = vmatprep.mubr.msk.bf16.mxu1 %vm63_vm0, %v325_v11 }
 0x1aa   :  { %v326_v14 = vpop.trf.xlu0 }
 0x1ab   :  { %611 = vmatmul.mubr.msk.bf16.gmra.mxu1 %vm63_vm0, %v326_v14 }
 0x1ae   :  { %v327_v15 = vpop.trf.xlu0 }
 0x1af   :  { %614 = vmatprep.mubr.msk.bf16.mxu1 %vm63_vm0, %v327_v15 }
 0x1b2   :  { %v328_v18 = vpop.trf.xlu0 }
 0x1b3   :  { %615 = vmatmul.mubr.msk.bf16.gmra.mxu1 %vm63_vm0, %v328_v18 }
 0x23b   :  { %v586_v19 = vpop.f32.mrf.mxu1 }
 0x23d   :  { %v250_v22 = vpop.f32.mrf.mxu1 }
 0x23f   :  { %v587_v23 = vpop.f32.mrf.mxu1 }
 0x241   :  { %v253_v26 = vpop.f32.mrf.mxu1 }
 0x243   :  { %v590_v27 = vpop.f32.mrf.mxu1 }
 0x245   :  { %v266_v30 = vpop.f32.mrf.mxu1 }
 0x247   :  { %v591_v31 = vpop.f32.mrf.mxu1 }
 0x249   :  { %v269_v32 = vpop.f32.mrf.mxu1 }
 0x24b   :  { %v594_v33 = vpop.f32.mrf.mxu1 }
 0x24d   :  { %v282_v34 = vpop.f32.mrf.mxu1 }
 0x24f   :  { %v595_v35 = vpop.f32.mrf.mxu1 }
 0x251   :  { %v285_v36 = vpop.f32.mrf.mxu1 }
 0x253   :  { %v811_v37 = vpop.f32.mrf.mxu1 }
 0x255   :  { %v813_v38 = vpop.f32.mrf.mxu1 }
 0x257   :  { %v815_v39 = vpop.f32.mrf.mxu1 }
 0x259   :  { %v817_v40 = vpop.f32.mrf.mxu1 }
 0x25b   :  { %v604_v41 = vpop.f32.mrf.mxu1 }
 0x25c   :  { %v402_v42 = vadd.f32 %v604_v41, %v586_v19 }
 0x25d   :  { %v393_v43 = vpop.f32.mrf.mxu1 }
 0x25e   :  { %458 = vst.msk [vmem:[%s972_s5 + $0x10] sm:$0xff] %vm63_vm0, %v402_v42  ;;  %v474_v44 = vsub.f32 %v756_v24, %v402_v42  ;;  %v394_v45 = vadd.f32 %v393_v43, %v250_v22 }
 0x25f   :  { %v605_v46 = vpop.f32.mrf.mxu1 }
 0x260   :  { %490 = vst.msk [vmem:[%s973_s6 + $0x10] sm:$0xff] %vm63_vm0, %v474_v44  ;;  %456 = vst.msk [vmem:[%s972_s5] sm:$0xff] %vm63_vm0, %v394_v45  ;;  %v472_v47 = vsub.f32 %v770_v28, %v394_v45  ;;  %v405_v48 = vadd.f32 %v605_v46, %v587_v23 }
 0x261   :  { %v396_v49 = vpop.f32.mrf.mxu1 }
 0x262   :  { %488 = vst.msk [vmem:[%s973_s6] sm:$0xff] %vm63_vm0, %v472_v47  ;;  %459 = vst.msk [vmem:[%s972_s5 + $0x18] sm:$0xff] %vm63_vm0, %v405_v48  ;;  %v475_v24 = vsub.f32 %v761_v25, %v405_v48  ;;  %v397_v50 = vadd.f32 %v396_v49, %v253_v26 }
 0x263   :  { %v608_v51 = vpop.f32.mrf.mxu1 }
 0x264   :  { %491 = vst.msk [vmem:[%s973_s6 + $0x18] sm:$0xff] %vm63_vm0, %v475_v24  ;;  %457 = vst.msk [vmem:[%s972_s5 + $0x8] sm:$0xff] %vm63_vm0, %v397_v50  ;;  %v473_v28 = vsub.f32 %v775_v29, %v397_v50  ;;  %v418_v52 = vadd.f32 %v608_v51, %v590_v27 }
 0x265   :  { %v409_v53 = vpop.f32.mrf.mxu1 }
 0x266   :  { %489 = vst.msk [vmem:[%s973_s6 + $0x8] sm:$0xff] %vm63_vm0, %v473_v28  ;;  %462 = vst.msk [vmem:[%s972_s5 + $0x30] sm:$0xff] %vm63_vm0, %v418_v52  ;;  %v478_v25 = vsub.f32 %v728_v16, %v418_v52  ;;  %v410_v54 = vadd.f32 %v409_v53, %v266_v30 }
 0x267   :  { %v609_v55 = vpop.f32.mrf.mxu1 }
 0x268   :  { %494 = vst.msk [vmem:[%s973_s6 + $0x30] sm:$0xff] %vm63_vm0, %v478_v25  ;;  %460 = vst.msk [vmem:[%s972_s5 + $0x20] sm:$0xff] %vm63_vm0, %v410_v54  ;;  %v476_v29 = vsub.f32 %v742_v20, %v410_v54  ;;  %v421_v56 = vadd.f32 %v609_v55, %v591_v31 }
 0x269   :  { %v412_v57 = vpop.f32.mrf.mxu1 }
 0x26a   :  { %492 = vst.msk [vmem:[%s973_s6 + $0x20] sm:$0xff] %vm63_vm0, %v476_v29  ;;  %463 = vst.msk [vmem:[%s972_s5 + $0x38] sm:$0xff] %vm63_vm0, %v421_v56  ;;  %v479_v16 = vsub.f32 %v733_v17, %v421_v56  ;;  %v413_v58 = vadd.f32 %v412_v57, %v269_v32 }
 0x26b   :  { %v612_v59 = vpop.f32.mrf.mxu1 }
 0x26c   :  { %495 = vst.msk [vmem:[%s973_s6 + $0x38] sm:$0xff] %vm63_vm0, %v479_v16  ;;  %461 = vst.msk [vmem:[%s972_s5 + $0x28] sm:$0xff] %vm63_vm0, %v413_v58  ;;  %v477_v20 = vsub.f32 %v747_v21, %v413_v58  ;;  %v434_v60 = vadd.f32 %v612_v59, %v594_v33 }
 0x26d   :  { %v425_v61 = vpop.f32.mrf.mxu1 }
 0x26e   :  { %493 = vst.msk [vmem:[%s973_s6 + $0x28] sm:$0xff] %vm63_vm0, %v477_v20  ;;  %466 = vst.msk [vmem:[%s972_s5 + $0x50] sm:$0xff] %vm63_vm0, %v434_v60  ;;  %v482_v17 = vsub.f32 %v696_v7, %v434_v60  ;;  %v426_v62 = vadd.f32 %v425_v61, %v282_v34 }
 0x26f   :  { %v613_v63 = vpop.f32.mrf.mxu1 }
 0x270   :  { %498 = vst.msk [vmem:[%s973_s6 + $0x50] sm:$0xff] %vm63_vm0, %v482_v17  ;;  %464 = vst.msk [vmem:[%s972_s5 + $0x40] sm:$0xff] %vm63_vm0, %v426_v62  ;;  %v480_v21 = vsub.f32 %v714_v12, %v426_v62  ;;  %v437_v3 = vadd.f32 %v613_v63, %v595_v35 }
 0x271   :  { %v428_v5 = vpop.f32.mrf.mxu1 }
 0x272   :  { %496 = vst.msk [vmem:[%s973_s6 + $0x40] sm:$0xff] %vm63_vm0, %v480_v21  ;;  %467 = vst.msk [vmem:[%s972_s5 + $0x58] sm:$0xff] %vm63_vm0, %v437_v3  ;;  %v483_v7 = vsub.f32 %v701_v8, %v437_v3  ;;  %v429_v6 = vadd.f32 %v428_v5, %v285_v36 }
 0x273   :  { %v616_v9 = vpop.f32.mrf.mxu1 }
 0x274   :  { %499 = vst.msk [vmem:[%s973_s6 + $0x58] sm:$0xff] %vm63_vm0, %v483_v7  ;;  %465 = vst.msk [vmem:[%s972_s5 + $0x48] sm:$0xff] %vm63_vm0, %v429_v6  ;;  %v481_v12 = vsub.f32 %v719_v13, %v429_v6  ;;  %v450_v10 = vadd.f32 %v616_v9, %v811_v37 }
 0x275   :  { %v441_v11 = vpop.f32.mrf.mxu1 }
 0x276   :  { %497 = vst.msk [vmem:[%s973_s6 + $0x48] sm:$0xff] %vm63_vm0, %v481_v12  ;;  %470 = vst.msk [vmem:[%s972_s5 + $0x70] sm:$0xff] %vm63_vm0, %v450_v10  ;;  %v486_v8 = vsub.f32 %v669_v0, %v450_v10  ;;  %v442_v14 = vadd.f32 %v441_v11, %v813_v38 }
 0x277   :  { %v617_v15 = vpop.f32.mrf.mxu1 }
 0x278   :  { %502 = vst.msk [vmem:[%s973_s6 + $0x70] sm:$0xff] %vm63_vm0, %v486_v8  ;;  %468 = vst.msk [vmem:[%s972_s5 + $0x60] sm:$0xff] %vm63_vm0, %v442_v14  ;;  %v484_v13 = vsub.f32 %v679_v2, %v442_v14  ;;  %v453_v18 = vadd.f32 %v617_v15, %v815_v39 }
 0x279   :  { %v444_v19 = vpop.f32.mrf.mxu1 }
 0x27a   :  { %500 = vst.msk [vmem:[%s973_s6 + $0x60] sm:$0xff] %vm63_vm0, %v484_v13  ;;  %471 = vst.msk [vmem:[%s972_s5 + $0x78] sm:$0xff] %vm63_vm0, %v453_v18  ;;  %v487_v0 = vsub.f32 %v674_v1, %v453_v18  ;;  %v445_v22 = vadd.f32 %v444_v19, %v817_v40 }
 0x27c   :  { %503 = vst.msk [vmem:[%s973_s6 + $0x78] sm:$0xff] %vm63_vm0, %v487_v0  ;;  %469 = vst.msk [vmem:[%s972_s5 + $0x68] sm:$0xff] %vm63_vm0, %v445_v22  ;;  %v485_v2 = vsub.f32 %v686_v4, %v445_v22 }
 0x27e   :  { %501 = vst.msk [vmem:[%s973_s6 + $0x68] sm:$0xff] %vm63_vm0, %v485_v2 }

</bundles_post_ra>
